<compile_context>
chip_gen: v7x
topology: tpu7x:2x2x1
jax: 0.10.0
libtpu: 0.0.40
codegen_flags: <defaults>
</compile_context>

<pallas_src>
import jax
import jax.numpy as jnp
from jax.experimental import pallas as pl
from jax.experimental.pallas import tpu as pltpu

# (in_features, out_features) for each of the 10 Linear layers, in forward order.
LAYER_DIMS = [
    (784, 128), (128, 64), (64, 32), (32, 16), (16, 8),      # encoder
    (8, 8), (8, 32), (32, 64), (64, 128), (128, 784),        # decoder
]
N_LAYERS = len(LAYER_DIMS)
D_IN = 784
FLOPS_PER_ROW = 2 * sum(fi * fo for fi, fo in LAYER_DIMS)    # 2 * MACs per row


def _round_up(n, m):
    return ((n + m - 1) // m) * m


def _ae_kernel(x_ref, *rest):
    """Full 10-layer autoencoder forward on one (TB, 784) batch tile."""
    out_ref = rest[-1]
    param_refs = rest[:-1]

    # Cast to bf16 inside the kernel (no wrapper-side pass over x).
    h = x_ref[...].astype(jnp.bfloat16)
    for li in range(N_LAYERS):
        w = param_refs[2 * li][...]            # bf16 (in, out), loaded at point of use
        b = param_refs[2 * li + 1][...]        # f32  (1, out)
        z = jnp.dot(h, w, preferred_element_type=jnp.float32) + b
        if li == N_LAYERS - 1:
            out_ref[...] = jnp.tanh(z).astype(out_ref.dtype)   # tanh in f32, cast on store
        else:
            h = jnp.maximum(z, 0.0).astype(jnp.bfloat16)


def _default_tile_batch():
    """Per-generation default batch-tile size."""
    try:
        kind = jax.devices()[0].device_kind.lower()
    except Exception:
        return 512
    if any(g in kind for g in ("v2", "v3", "v4", "v5")):
        return 512        # 16 MiB scoped-VMEM default, lower HBM BW
    return 1024           # v6e / v7x: amortize per-grid-step overhead


def _choose_tb(batch, tile_batch):
    """Rows per batch tile: multiple of 8 (sublane); >=2 tiles once batch >= 256
    (v7x megacore sharding); padding waste kept under ~one block."""
    align = 128 if tile_batch >= 128 else 8
    tile_batch = max(align, _round_up(tile_batch, align))
    b_small = _round_up(batch, 8)
    if batch < 256 and b_small <= tile_batch:
        return b_small                                   # one (near-)exact tile
    b_pad = _round_up(batch, align)
    num_tiles = max(2, pl.cdiv(b_pad, tile_batch))       # >=2 tiles for 2 TCs on v7x
    return _round_up(pl.cdiv(b_pad, num_tiles), align)


def init_params(key):
    """Deterministic params matching torch.nn.Linear default-init shapes.

    Returns a flat list [w0, b0, w1, b1, ...] with w: (in, out), b: (1, out), f32.
    """
    params = []
    for (fan_in, fan_out) in LAYER_DIMS:
        key, kw, kb = jax.random.split(key, 3)
        bound = 1.0 / jnp.sqrt(jnp.float32(fan_in))
        w = jax.random.uniform(kw, (fan_in, fan_out), jnp.float32, -bound, bound)
        b = jax.random.uniform(kb, (1, fan_out), jnp.float32, -bound, bound)
        params += [w, b]
    return params


def autoencoder_forward(x, params, *, tile_batch=None, out_dtype=jnp.float32):
    """x: (B, 784) float32 -> (B, 784) out_dtype (default float32).

    Set out_dtype=jnp.bfloat16 to halve the output writeback (opt-in: slightly
    lower precision on the tanh reconstruction).
    """
    B, D = x.shape
    assert D == D_IN, "Autoencoder expects flattened 28x28 inputs (784 features)"

    if tile_batch is None:
        tile_batch = _default_tile_batch()
    TB = _choose_tb(B, tile_batch)
    num_tiles = pl.cdiv(B, TB)       # ragged last tile handled by OOB masking

    # Cast weights once to bf16 (MXU operands); biases stay f32.  No feature
    # padding: w0 keeps 784 rows, w9/b9 keep 784 columns.
    operands = [x]
    for li in range(N_LAYERS):
        operands.append(params[2 * li].astype(jnp.bfloat16))
        operands.append(params[2 * li + 1].astype(jnp.float32))

    param_bytes = sum(int(a.size) * a.dtype.itemsize for a in operands[1:])
    out_itemsize = jnp.dtype(out_dtype).itemsize
    in_tile_bytes = TB * D_IN * 4
    out_tile_bytes = TB * D_IN * out_itemsize
    # Double-buffered activation tiles + (worst-case double-buffered) params
    # + headroom for in-kernel intermediates (bf16 x copy, f32 z, tanh temp).
    est = (2 * in_tile_bytes + 2 * out_tile_bytes + 2 * param_bytes
           + 3 * in_tile_bytes + (2 << 20))
    vmem_limit = int(min(64 << 20, max(32 << 20, est)))   # <= v7x physical VMEM

    x_spec = pl.BlockSpec((TB, D_IN), lambda i: (i, 0))
    # Params: full-extent blocks, constant index -> VMEM-resident across steps.
    # (pipeline_mode=pl.Buffered(1) would shave ~0.5 MB of double-buffering; kept
    #  default for portability since the headroom is not needed at these TBs.)
    param_specs = [pl.BlockSpec(a.shape, lambda i: (0, 0)) for a in operands[1:]]
    out_spec = pl.BlockSpec((TB, D_IN), lambda i: (i, 0))

    cost = pl.CostEstimate(
        flops=int(B) * FLOPS_PER_ROW,
        transcendentals=int(B) * D_IN,                    # final 784-wide tanh
        bytes_accessed=int(B) * D_IN * 4 + int(B) * D_IN * out_itemsize + param_bytes,
    )

    return pl.pallas_call(
        _ae_kernel,
        out_shape=jax.ShapeDtypeStruct((B, D_IN), out_dtype),
        grid=(num_tiles,),
        in_specs=[x_spec] + param_specs,
        out_specs=out_spec,
        compiler_params=pltpu.CompilerParams(
            dimension_semantics=("parallel",),            # independent batch tiles
            vmem_limit_bytes=vmem_limit,
        ),
        cost_estimate=cost,
    )(*operands)


def _reference_forward(x, params):
    """Pure-JAX reference with the same bf16-matmul / f32-accumulate recipe."""
    h = x.astype(jnp.float32)
    for li in range(N_LAYERS):
        w = params[2 * li].astype(jnp.bfloat16)
        b = params[2 * li + 1].astype(jnp.float32)
        z = jnp.dot(h.astype(jnp.bfloat16), w,
                    preferred_element_type=jnp.float32) + b
        if li == N_LAYERS - 1:
            h = jnp.tanh(z)
        else:
            h = jnp.maximum(z, 0.0)
    return h


if __name__ == "__main__":
    key = jax.random.PRNGKey(0)
    key_params, key_x1, key_x2 = jax.random.split(key, 3)

    params = init_params(key_params)

    # 1) Small exact-tile batch of flattened 28x28 "images".
    x1 = jax.random.normal(key_x1, (8, 784), dtype=jnp.float32)
    out1 = jax.block_until_ready(autoencoder_forward(x1, params))
    ref1 = _reference_forward(x1, params)
    assert out1.shape == (8, 784)
    assert jnp.allclose(out1, ref1, atol=2e-3, rtol=2e-3), "mismatch (exact tile)"

    # 2) Ragged multi-tile batch: grid of 3 tiles of 16 rows, last tile partially
    #    out of bounds (exercises the no-padding masked tail path).
    x2 = jax.random.normal(key_x2, (40, 784), dtype=jnp.float32)
    out2 = jax.block_until_ready(autoencoder_forward(x2, params, tile_batch=16))
    ref2 = _reference_forward(x2, params)
    assert out2.shape == (40, 784)
    assert jnp.allclose(out2, ref2, atol=2e-3, rtol=2e-3), "mismatch (ragged tiles)"

    print("KERNEL_OK")
</pallas_src>

<mosaic_0001>
module attributes {stable_mosaic.version = 11 : i64} {
  func.func @_ae_kernel(%arg0: i32, %arg1: memref<8x784xf32, #tpu.memory_space<vmem>>, %arg2: memref<784x128xbf16, #tpu.memory_space<vmem>>, %arg3: memref<1x128xf32, #tpu.memory_space<vmem>>, %arg4: memref<128x64xbf16, #tpu.memory_space<vmem>>, %arg5: memref<1x64xf32, #tpu.memory_space<vmem>>, %arg6: memref<64x32xbf16, #tpu.memory_space<vmem>>, %arg7: memref<1x32xf32, #tpu.memory_space<vmem>>, %arg8: memref<32x16xbf16, #tpu.memory_space<vmem>>, %arg9: memref<1x16xf32, #tpu.memory_space<vmem>>, %arg10: memref<16x8xbf16, #tpu.memory_space<vmem>>, %arg11: memref<1x8xf32, #tpu.memory_space<vmem>>, %arg12: memref<8x8xbf16, #tpu.memory_space<vmem>>, %arg13: memref<1x8xf32, #tpu.memory_space<vmem>>, %arg14: memref<8x32xbf16, #tpu.memory_space<vmem>>, %arg15: memref<1x32xf32, #tpu.memory_space<vmem>>, %arg16: memref<32x64xbf16, #tpu.memory_space<vmem>>, %arg17: memref<1x64xf32, #tpu.memory_space<vmem>>, %arg18: memref<64x128xbf16, #tpu.memory_space<vmem>>, %arg19: memref<1x128xf32, #tpu.memory_space<vmem>>, %arg20: memref<128x784xbf16, #tpu.memory_space<vmem>>, %arg21: memref<1x784xf32, #tpu.memory_space<vmem>>, %arg22: memref<8x784xf32, #tpu.memory_space<vmem>>) attributes {dimension_semantics = [#tpu.dimension_semantics<parallel>], iteration_bounds = array<i64: 1>, scalar_prefetch = 0 : i64, scratch_operands = 0 : i64, tpu.core_type = #tpu.core_type<tc>, window_params = [{transform_indices = @transform_0, window_bounds = array<i64: 8, 784>}, {pipeline_mode = #tpu.pipeline_mode<synchronous>, transform_indices = @transform_1, window_bounds = array<i64: 784, 128>}, {pipeline_mode = #tpu.pipeline_mode<synchronous>, transform_indices = @transform_2, window_bounds = array<i64: 1, 128>}, {pipeline_mode = #tpu.pipeline_mode<synchronous>, transform_indices = @transform_3, window_bounds = array<i64: 128, 64>}, {pipeline_mode = #tpu.pipeline_mode<synchronous>, transform_indices = @transform_4, window_bounds = array<i64: 1, 64>}, {pipeline_mode = #tpu.pipeline_mode<synchronous>, transform_indices = @transform_5, window_bounds = array<i64: 64, 32>}, {pipeline_mode = #tpu.pipeline_mode<synchronous>, transform_indices = @transform_6, window_bounds = array<i64: 1, 32>}, {pipeline_mode = #tpu.pipeline_mode<synchronous>, transform_indices = @transform_7, window_bounds = array<i64: 32, 16>}, {pipeline_mode = #tpu.pipeline_mode<synchronous>, transform_indices = @transform_8, window_bounds = array<i64: 1, 16>}, {pipeline_mode = #tpu.pipeline_mode<synchronous>, transform_indices = @transform_9, window_bounds = array<i64: 16, 8>}, {pipeline_mode = #tpu.pipeline_mode<synchronous>, transform_indices = @transform_10, window_bounds = array<i64: 1, 8>}, {pipeline_mode = #tpu.pipeline_mode<synchronous>, transform_indices = @transform_11, window_bounds = array<i64: 8, 8>}, {pipeline_mode = #tpu.pipeline_mode<synchronous>, transform_indices = @transform_12, window_bounds = array<i64: 1, 8>}, {pipeline_mode = #tpu.pipeline_mode<synchronous>, transform_indices = @transform_13, window_bounds = array<i64: 8, 32>}, {pipeline_mode = #tpu.pipeline_mode<synchronous>, transform_indices = @transform_14, window_bounds = array<i64: 1, 32>}, {pipeline_mode = #tpu.pipeline_mode<synchronous>, transform_indices = @transform_15, window_bounds = array<i64: 32, 64>}, {pipeline_mode = #tpu.pipeline_mode<synchronous>, transform_indices = @transform_16, window_bounds = array<i64: 1, 64>}, {pipeline_mode = #tpu.pipeline_mode<synchronous>, transform_indices = @transform_17, window_bounds = array<i64: 64, 128>}, {pipeline_mode = #tpu.pipeline_mode<synchronous>, transform_indices = @transform_18, window_bounds = array<i64: 1, 128>}, {pipeline_mode = #tpu.pipeline_mode<synchronous>, transform_indices = @transform_19, window_bounds = array<i64: 128, 784>}, {pipeline_mode = #tpu.pipeline_mode<synchronous>, transform_indices = @transform_20, window_bounds = array<i64: 1, 784>}, {transform_indices = @transform_21, window_bounds = array<i64: 8, 784>}]} {
    %c0 = arith.constant 0 : index
    %c0_0 = arith.constant 0 : index
    %0 = vector.load %arg1[%c0, %c0_0] : memref<8x784xf32, #tpu.memory_space<vmem>>, vector<8x784xf32>
    %1 = arith.truncf %0 : vector<8x784xf32> to vector<8x784xbf16>
    %c0_1 = arith.constant 0 : index
    %c0_2 = arith.constant 0 : index
    %2 = vector.load %arg2[%c0_1, %c0_2] : memref<784x128xbf16, #tpu.memory_space<vmem>>, vector<784x128xbf16>
    %c0_3 = arith.constant 0 : index
    %c0_4 = arith.constant 0 : index
    %3 = vector.load %arg3[%c0_3, %c0_4] : memref<1x128xf32, #tpu.memory_space<vmem>>, vector<1x128xf32>
    %cst = arith.constant dense<0.000000e+00> : vector<8x128xf32>
    %4 = tpu.matmul %1, %2, %cst {dimension_numbers = #tpu.dot_dimension_numbers<[1], [0], [0], [1], [0, 0, 1, 1], [], []>} : vector<8x784xbf16>, vector<784x128xbf16>, vector<8x128xf32> -> vector<8x128xf32>
    %5 = vector.broadcast %3 : vector<1x128xf32> to vector<8x128xf32>
    %6 = arith.addf %4, %5 : vector<8x128xf32>
    %cst_5 = arith.constant 0.000000e+00 : f32
    %7 = vector.broadcast %cst_5 : f32 to vector<8x128xf32>
    %8 = arith.maximumf %6, %7 : vector<8x128xf32>
    %9 = arith.truncf %8 : vector<8x128xf32> to vector<8x128xbf16>
    %c0_6 = arith.constant 0 : index
    %c0_7 = arith.constant 0 : index
    %10 = vector.load %arg4[%c0_6, %c0_7] : memref<128x64xbf16, #tpu.memory_space<vmem>>, vector<128x64xbf16>
    %c0_8 = arith.constant 0 : index
    %c0_9 = arith.constant 0 : index
    %11 = vector.load %arg5[%c0_8, %c0_9] : memref<1x64xf32, #tpu.memory_space<vmem>>, vector<1x64xf32>
    %cst_10 = arith.constant dense<0.000000e+00> : vector<8x64xf32>
    %12 = tpu.matmul %9, %10, %cst_10 {dimension_numbers = #tpu.dot_dimension_numbers<[1], [0], [0], [1], [0, 0, 1, 1], [], []>} : vector<8x128xbf16>, vector<128x64xbf16>, vector<8x64xf32> -> vector<8x64xf32>
    %13 = vector.broadcast %11 : vector<1x64xf32> to vector<8x64xf32>
    %14 = arith.addf %12, %13 : vector<8x64xf32>
    %cst_11 = arith.constant 0.000000e+00 : f32
    %15 = vector.broadcast %cst_11 : f32 to vector<8x64xf32>
    %16 = arith.maximumf %14, %15 : vector<8x64xf32>
    %17 = arith.truncf %16 : vector<8x64xf32> to vector<8x64xbf16>
    %c0_12 = arith.constant 0 : index
    %c0_13 = arith.constant 0 : index
    %18 = vector.load %arg6[%c0_12, %c0_13] : memref<64x32xbf16, #tpu.memory_space<vmem>>, vector<64x32xbf16>
    %c0_14 = arith.constant 0 : index
    %c0_15 = arith.constant 0 : index
    %19 = vector.load %arg7[%c0_14, %c0_15] : memref<1x32xf32, #tpu.memory_space<vmem>>, vector<1x32xf32>
    %cst_16 = arith.constant dense<0.000000e+00> : vector<8x32xf32>
    %20 = tpu.matmul %17, %18, %cst_16 {dimension_numbers = #tpu.dot_dimension_numbers<[1], [0], [0], [1], [0, 0, 1, 1], [], []>} : vector<8x64xbf16>, vector<64x32xbf16>, vector<8x32xf32> -> vector<8x32xf32>
    %21 = vector.broadcast %19 : vector<1x32xf32> to vector<8x32xf32>
    %22 = arith.addf %20, %21 : vector<8x32xf32>
    %cst_17 = arith.constant 0.000000e+00 : f32
    %23 = vector.broadcast %cst_17 : f32 to vector<8x32xf32>
    %24 = arith.maximumf %22, %23 : vector<8x32xf32>
    %25 = arith.truncf %24 : vector<8x32xf32> to vector<8x32xbf16>
    %c0_18 = arith.constant 0 : index
    %c0_19 = arith.constant 0 : index
    %26 = vector.load %arg8[%c0_18, %c0_19] : memref<32x16xbf16, #tpu.memory_space<vmem>>, vector<32x16xbf16>
    %c0_20 = arith.constant 0 : index
    %c0_21 = arith.constant 0 : index
    %27 = vector.load %arg9[%c0_20, %c0_21] : memref<1x16xf32, #tpu.memory_space<vmem>>, vector<1x16xf32>
    %cst_22 = arith.constant dense<0.000000e+00> : vector<8x16xf32>
    %28 = tpu.matmul %25, %26, %cst_22 {dimension_numbers = #tpu.dot_dimension_numbers<[1], [0], [0], [1], [0, 0, 1, 1], [], []>} : vector<8x32xbf16>, vector<32x16xbf16>, vector<8x16xf32> -> vector<8x16xf32>
    %29 = vector.broadcast %27 : vector<1x16xf32> to vector<8x16xf32>
    %30 = arith.addf %28, %29 : vector<8x16xf32>
    %cst_23 = arith.constant 0.000000e+00 : f32
    %31 = vector.broadcast %cst_23 : f32 to vector<8x16xf32>
    %32 = arith.maximumf %30, %31 : vector<8x16xf32>
    %33 = arith.truncf %32 : vector<8x16xf32> to vector<8x16xbf16>
    %c0_24 = arith.constant 0 : index
    %c0_25 = arith.constant 0 : index
    %34 = vector.load %arg10[%c0_24, %c0_25] : memref<16x8xbf16, #tpu.memory_space<vmem>>, vector<16x8xbf16>
    %c0_26 = arith.constant 0 : index
    %c0_27 = arith.constant 0 : index
    %35 = vector.load %arg11[%c0_26, %c0_27] : memref<1x8xf32, #tpu.memory_space<vmem>>, vector<1x8xf32>
    %cst_28 = arith.constant dense<0.000000e+00> : vector<8x8xf32>
    %36 = tpu.matmul %33, %34, %cst_28 {dimension_numbers = #tpu.dot_dimension_numbers<[1], [0], [0], [1], [0, 0, 1, 1], [], []>} : vector<8x16xbf16>, vector<16x8xbf16>, vector<8x8xf32> -> vector<8x8xf32>
    %37 = vector.broadcast %35 : vector<1x8xf32> to vector<8x8xf32>
    %38 = arith.addf %36, %37 : vector<8x8xf32>
    %cst_29 = arith.constant 0.000000e+00 : f32
    %39 = vector.broadcast %cst_29 : f32 to vector<8x8xf32>
    %40 = arith.maximumf %38, %39 : vector<8x8xf32>
    %41 = arith.truncf %40 : vector<8x8xf32> to vector<8x8xbf16>
    %c0_30 = arith.constant 0 : index
    %c0_31 = arith.constant 0 : index
    %42 = vector.load %arg12[%c0_30, %c0_31] : memref<8x8xbf16, #tpu.memory_space<vmem>>, vector<8x8xbf16>
    %c0_32 = arith.constant 0 : index
    %c0_33 = arith.constant 0 : index
    %43 = vector.load %arg13[%c0_32, %c0_33] : memref<1x8xf32, #tpu.memory_space<vmem>>, vector<1x8xf32>
    %cst_34 = arith.constant dense<0.000000e+00> : vector<8x8xf32>
    %44 = tpu.matmul %41, %42, %cst_34 {dimension_numbers = #tpu.dot_dimension_numbers<[1], [0], [0], [1], [0, 0, 1, 1], [], []>} : vector<8x8xbf16>, vector<8x8xbf16>, vector<8x8xf32> -> vector<8x8xf32>
    %45 = vector.broadcast %43 : vector<1x8xf32> to vector<8x8xf32>
    %46 = arith.addf %44, %45 : vector<8x8xf32>
    %cst_35 = arith.constant 0.000000e+00 : f32
    %47 = vector.broadcast %cst_35 : f32 to vector<8x8xf32>
    %48 = arith.maximumf %46, %47 : vector<8x8xf32>
    %49 = arith.truncf %48 : vector<8x8xf32> to vector<8x8xbf16>
    %c0_36 = arith.constant 0 : index
    %c0_37 = arith.constant 0 : index
    %50 = vector.load %arg14[%c0_36, %c0_37] : memref<8x32xbf16, #tpu.memory_space<vmem>>, vector<8x32xbf16>
    %c0_38 = arith.constant 0 : index
    %c0_39 = arith.constant 0 : index
    %51 = vector.load %arg15[%c0_38, %c0_39] : memref<1x32xf32, #tpu.memory_space<vmem>>, vector<1x32xf32>
    %cst_40 = arith.constant dense<0.000000e+00> : vector<8x32xf32>
    %52 = tpu.matmul %49, %50, %cst_40 {dimension_numbers = #tpu.dot_dimension_numbers<[1], [0], [0], [1], [0, 0, 1, 1], [], []>} : vector<8x8xbf16>, vector<8x32xbf16>, vector<8x32xf32> -> vector<8x32xf32>
    %53 = vector.broadcast %51 : vector<1x32xf32> to vector<8x32xf32>
    %54 = arith.addf %52, %53 : vector<8x32xf32>
    %cst_41 = arith.constant 0.000000e+00 : f32
    %55 = vector.broadcast %cst_41 : f32 to vector<8x32xf32>
    %56 = arith.maximumf %54, %55 : vector<8x32xf32>
    %57 = arith.truncf %56 : vector<8x32xf32> to vector<8x32xbf16>
    %c0_42 = arith.constant 0 : index
    %c0_43 = arith.constant 0 : index
    %58 = vector.load %arg16[%c0_42, %c0_43] : memref<32x64xbf16, #tpu.memory_space<vmem>>, vector<32x64xbf16>
    %c0_44 = arith.constant 0 : index
    %c0_45 = arith.constant 0 : index
    %59 = vector.load %arg17[%c0_44, %c0_45] : memref<1x64xf32, #tpu.memory_space<vmem>>, vector<1x64xf32>
    %cst_46 = arith.constant dense<0.000000e+00> : vector<8x64xf32>
    %60 = tpu.matmul %57, %58, %cst_46 {dimension_numbers = #tpu.dot_dimension_numbers<[1], [0], [0], [1], [0, 0, 1, 1], [], []>} : vector<8x32xbf16>, vector<32x64xbf16>, vector<8x64xf32> -> vector<8x64xf32>
    %61 = vector.broadcast %59 : vector<1x64xf32> to vector<8x64xf32>
    %62 = arith.addf %60, %61 : vector<8x64xf32>
    %cst_47 = arith.constant 0.000000e+00 : f32
    %63 = vector.broadcast %cst_47 : f32 to vector<8x64xf32>
    %64 = arith.maximumf %62, %63 : vector<8x64xf32>
    %65 = arith.truncf %64 : vector<8x64xf32> to vector<8x64xbf16>
    %c0_48 = arith.constant 0 : index
    %c0_49 = arith.constant 0 : index
    %66 = vector.load %arg18[%c0_48, %c0_49] : memref<64x128xbf16, #tpu.memory_space<vmem>>, vector<64x128xbf16>
    %c0_50 = arith.constant 0 : index
    %c0_51 = arith.constant 0 : index
    %67 = vector.load %arg19[%c0_50, %c0_51] : memref<1x128xf32, #tpu.memory_space<vmem>>, vector<1x128xf32>
    %cst_52 = arith.constant dense<0.000000e+00> : vector<8x128xf32>
    %68 = tpu.matmul %65, %66, %cst_52 {dimension_numbers = #tpu.dot_dimension_numbers<[1], [0], [0], [1], [0, 0, 1, 1], [], []>} : vector<8x64xbf16>, vector<64x128xbf16>, vector<8x128xf32> -> vector<8x128xf32>
    %69 = vector.broadcast %67 : vector<1x128xf32> to vector<8x128xf32>
    %70 = arith.addf %68, %69 : vector<8x128xf32>
    %cst_53 = arith.constant 0.000000e+00 : f32
    %71 = vector.broadcast %cst_53 : f32 to vector<8x128xf32>
    %72 = arith.maximumf %70, %71 : vector<8x128xf32>
    %73 = arith.truncf %72 : vector<8x128xf32> to vector<8x128xbf16>
    %c0_54 = arith.constant 0 : index
    %c0_55 = arith.constant 0 : index
    %74 = vector.load %arg20[%c0_54, %c0_55] : memref<128x784xbf16, #tpu.memory_space<vmem>>, vector<128x784xbf16>
    %c0_56 = arith.constant 0 : index
    %c0_57 = arith.constant 0 : index
    %75 = vector.load %arg21[%c0_56, %c0_57] : memref<1x784xf32, #tpu.memory_space<vmem>>, vector<1x784xf32>
    %cst_58 = arith.constant dense<0.000000e+00> : vector<8x784xf32>
    %76 = tpu.matmul %73, %74, %cst_58 {dimension_numbers = #tpu.dot_dimension_numbers<[1], [0], [0], [1], [0, 0, 1, 1], [], []>} : vector<8x128xbf16>, vector<128x784xbf16>, vector<8x784xf32> -> vector<8x784xf32>
    %77 = vector.broadcast %75 : vector<1x784xf32> to vector<8x784xf32>
    %78 = arith.addf %76, %77 : vector<8x784xf32>
    %79 = math.tanh %78 : vector<8x784xf32>
    %c0_59 = arith.constant 0 : index
    %c0_60 = arith.constant 0 : index
    %80 = vector.load %arg22[%c0_59, %c0_60] : memref<8x784xf32, #tpu.memory_space<vmem>>, vector<8x784xf32>
    tpu.vector_store %arg22[%c0_59, %c0_60], %79 {strides = array<i32>} : memref<8x784xf32, #tpu.memory_space<vmem>>, vector<8x784xf32>,
    return
  }
  func.func @transform_0(%arg0: i32) -> (i32, i32) {
    %c0_i32 = arith.constant 0 : i32
    %c0_i32_0 = arith.constant 0 : i32
    return %arg0, %c0_i32 : i32, i32
  }
  func.func @transform_1(%arg0: i32) -> (i32, i32) {
    %c0_i32 = arith.constant 0 : i32
    %c0_i32_0 = arith.constant 0 : i32
    %c0_i32_1 = arith.constant 0 : i32
    return %c0_i32, %c0_i32_0 : i32, i32
  }
  func.func @transform_2(%arg0: i32) -> (i32, i32) {
    %c0_i32 = arith.constant 0 : i32
    %c0_i32_0 = arith.constant 0 : i32
    %c0_i32_1 = arith.constant 0 : i32
    return %c0_i32, %c0_i32_0 : i32, i32
  }
  func.func @transform_3(%arg0: i32) -> (i32, i32) {
    %c0_i32 = arith.constant 0 : i32
    %c0_i32_0 = arith.constant 0 : i32
    %c0_i32_1 = arith.constant 0 : i32
    return %c0_i32, %c0_i32_0 : i32, i32
  }
  func.func @transform_4(%arg0: i32) -> (i32, i32) {
    %c0_i32 = arith.constant 0 : i32
    %c0_i32_0 = arith.constant 0 : i32
    %c0_i32_1 = arith.constant 0 : i32
    return %c0_i32, %c0_i32_0 : i32, i32
  }
  func.func @transform_5(%arg0: i32) -> (i32, i32) {
    %c0_i32 = arith.constant 0 : i32
    %c0_i32_0 = arith.constant 0 : i32
    %c0_i32_1 = arith.constant 0 : i32
    return %c0_i32, %c0_i32_0 : i32, i32
  }
  func.func @transform_6(%arg0: i32) -> (i32, i32) {
    %c0_i32 = arith.constant 0 : i32
    %c0_i32_0 = arith.constant 0 : i32
    %c0_i32_1 = arith.constant 0 : i32
    return %c0_i32, %c0_i32_0 : i32, i32
  }
  func.func @transform_7(%arg0: i32) -> (i32, i32) {
    %c0_i32 = arith.constant 0 : i32
    %c0_i32_0 = arith.constant 0 : i32
    %c0_i32_1 = arith.constant 0 : i32
    return %c0_i32, %c0_i32_0 : i32, i32
  }
  func.func @transform_8(%arg0: i32) -> (i32, i32) {
    %c0_i32 = arith.constant 0 : i32
    %c0_i32_0 = arith.constant 0 : i32
    %c0_i32_1 = arith.constant 0 : i32
    return %c0_i32, %c0_i32_0 : i32, i32
  }
  func.func @transform_9(%arg0: i32) -> (i32, i32) {
    %c0_i32 = arith.constant 0 : i32
    %c0_i32_0 = arith.constant 0 : i32
    %c0_i32_1 = arith.constant 0 : i32
    return %c0_i32, %c0_i32_0 : i32, i32
  }
  func.func @transform_10(%arg0: i32) -> (i32, i32) {
    %c0_i32 = arith.constant 0 : i32
    %c0_i32_0 = arith.constant 0 : i32
    %c0_i32_1 = arith.constant 0 : i32
    return %c0_i32, %c0_i32_0 : i32, i32
  }
  func.func @transform_11(%arg0: i32) -> (i32, i32) {
    %c0_i32 = arith.constant 0 : i32
    %c0_i32_0 = arith.constant 0 : i32
    %c0_i32_1 = arith.constant 0 : i32
    return %c0_i32, %c0_i32_0 : i32, i32
  }
  func.func @transform_12(%arg0: i32) -> (i32, i32) {
    %c0_i32 = arith.constant 0 : i32
    %c0_i32_0 = arith.constant 0 : i32
    %c0_i32_1 = arith.constant 0 : i32
    return %c0_i32, %c0_i32_0 : i32, i32
  }
  func.func @transform_13(%arg0: i32) -> (i32, i32) {
    %c0_i32 = arith.constant 0 : i32
    %c0_i32_0 = arith.constant 0 : i32
    %c0_i32_1 = arith.constant 0 : i32
    return %c0_i32, %c0_i32_0 : i32, i32
  }
  func.func @transform_14(%arg0: i32) -> (i32, i32) {
    %c0_i32 = arith.constant 0 : i32
    %c0_i32_0 = arith.constant 0 : i32
    %c0_i32_1 = arith.constant 0 : i32
    return %c0_i32, %c0_i32_0 : i32, i32
  }
  func.func @transform_15(%arg0: i32) -> (i32, i32) {
    %c0_i32 = arith.constant 0 : i32
    %c0_i32_0 = arith.constant 0 : i32
    %c0_i32_1 = arith.constant 0 : i32
    return %c0_i32, %c0_i32_0 : i32, i32
  }
  func.func @transform_16(%arg0: i32) -> (i32, i32) {
    %c0_i32 = arith.constant 0 : i32
    %c0_i32_0 = arith.constant 0 : i32
    %c0_i32_1 = arith.constant 0 : i32
    return %c0_i32, %c0_i32_0 : i32, i32
  }
  func.func @transform_17(%arg0: i32) -> (i32, i32) {
    %c0_i32 = arith.constant 0 : i32
    %c0_i32_0 = arith.constant 0 : i32
    %c0_i32_1 = arith.constant 0 : i32
    return %c0_i32, %c0_i32_0 : i32, i32
  }
  func.func @transform_18(%arg0: i32) -> (i32, i32) {
    %c0_i32 = arith.constant 0 : i32
    %c0_i32_0 = arith.constant 0 : i32
    %c0_i32_1 = arith.constant 0 : i32
    return %c0_i32, %c0_i32_0 : i32, i32
  }
  func.func @transform_19(%arg0: i32) -> (i32, i32) {
    %c0_i32 = arith.constant 0 : i32
    %c0_i32_0 = arith.constant 0 : i32
    %c0_i32_1 = arith.constant 0 : i32
    return %c0_i32, %c0_i32_0 : i32, i32
  }
  func.func @transform_20(%arg0: i32) -> (i32, i32) {
    %c0_i32 = arith.constant 0 : i32
    %c0_i32_0 = arith.constant 0 : i32
    %c0_i32_1 = arith.constant 0 : i32
    return %c0_i32, %c0_i32_0 : i32, i32
  }
  func.func @transform_21(%arg0: i32) -> (i32, i32) {
    %c0_i32 = arith.constant 0 : i32
    %c0_i32_0 = arith.constant 0 : i32
    return %arg0, %c0_i32 : i32, i32
  }
}

</mosaic_0001>

<bundles_post_ra>
// kernel: tpu_custom_call.1
= control target key start
LH: loop header
LB: loop body
LE: loop exit
PB: predicated region body
PF: predicated region fallthrough
CT: control target
= control target key end

     0   :  { %s2989_s0 = inlined_call_operand.vmem [shape: f32[8,784], index: 0, kind: input, shape index: {}]   ;;  %s2990_s1 = inlined_call_operand.vmem [shape: bf16[784,128], index: 1, kind: input, shape index: {}]   ;;  %s2991_s2 = inlined_call_operand.vmem [shape: f32[1,128], index: 2, kind: input, shape index: {}]   ;;  %s2992_s3 = inlined_call_operand.vmem [shape: bf16[128,64], index: 3, kind: input, shape index: {}]   ;;  %s2993_s4 = inlined_call_operand.vmem [shape: f32[1,64], index: 4, kind: input, shape index: {}]   ;;  %s2994_s5 = inlined_call_operand.vmem [shape: bf16[64,32], index: 5, kind: input, shape index: {}]   ;;  %s2995_s6 = inlined_call_operand.vmem [shape: f32[1,32], index: 6, kind: input, shape index: {}]   ;;  %s2996_s7 = inlined_call_operand.vmem [shape: bf16[32,16], index: 7, kind: input, shape index: {}]   ;;  %s2997_s8 = inlined_call_operand.vmem [shape: f32[1,16], index: 8, kind: input, shape index: {}]   ;;  %s2998_s9 = inlined_call_operand.vmem [shape: bf16[16,8], index: 9, kind: input, shape index: {}]   ;;  %s2999_s10 = inlined_call_operand.vmem [shape: f32[1,8], index: 10, kind: input, shape index: {}]   ;;  %s3000_s11 = inlined_call_operand.vmem [shape: bf16[8,8], index: 11, kind: input, shape index: {}]   ;;  %s3001_s12 = inlined_call_operand.vmem [shape: f32[1,8], index: 12, kind: input, shape index: {}]   ;;  %s3002_s13 = inlined_call_operand.vmem [shape: bf16[8,32], index: 13, kind: input, shape index: {}]   ;;  %s3003_s14 = inlined_call_operand.vmem [shape: f32[1,32], index: 14, kind: input, shape index: {}]   ;;  %s3004_s15 = inlined_call_operand.vmem [shape: bf16[32,64], index: 15, kind: input, shape index: {}]   ;;  %s3005_s16 = inlined_call_operand.vmem [shape: f32[1,64], index: 16, kind: input, shape index: {}]   ;;  %s3006_s17 = inlined_call_operand.vmem [shape: bf16[64,128], index: 17, kind: input, shape index: {}]   ;;  %s3007_s18 = inlined_call_operand.vmem [shape: f32[1,128], index: 18, kind: input, shape index: {}]   ;;  %s3008_s19 = inlined_call_operand.vmem [shape: bf16[128,784], index: 19, kind: input, shape index: {}]   ;;  %s3009_s20 = inlined_call_operand.vmem [shape: f32[1,784], index: 20, kind: input, shape index: {}]   ;;  %s3010_s21 = inlined_call_operand.hbm [shape: f32[8,784], index: 21, kind: output, shape index: {}]  }
   0x1   :  { %3015 = sst [smem:[#allocation5_spill]] %s2989_s0 }
   0x2   :  { %3016 = sst [smem:[#allocation6_spill]] %s2990_s1 }
   0x3   :  { %3017 = sst [smem:[#allocation7_spill]] %s2991_s2 }
   0x4   :  { %3018 = sst [smem:[#allocation8_spill]] %s2992_s3 }
   0x5   :  { %3019 = sst [smem:[#allocation9_spill]] %s2993_s4 }
   0x6   :  { %3020 = sst [smem:[#allocation10_spill]] %s2994_s5 }
   0x7   :  { %s3021_s26 = sld [smem:[#allocation6_spill]]  ;;  %s3022_s30 = sld [smem:[#allocation5_spill]]  ;;  %v2369_v44 = vmov 0.0   ;;  %vm2370_vm0 = vmmov 0   ;;  %vm483_vm1 = vcmask 130048  }
   0xd   :  { %v2181_v0 = vld [vmem:[%s3021_s26 + $0x40] sm:$0xff]   ;;  %v2185_v4 = vld [vmem:[%s3021_s26 + $0x48] sm:$0xff]   ;;  %v2189_v8 = vld [vmem:[%s3021_s26 + $0x50] sm:$0xff]  }
   0xe   :  { %v2182_v1 = vld [vmem:[%s3021_s26] sm:$0xff]   ;;  %1965 = vmatprep.subr.bf16.mxu0 %v2181_v0  ;;  %v2186_v5 = vld [vmem:[%s3021_s26 + $0x8] sm:$0xff]   ;;  %v2190_v9 = vld [vmem:[%s3021_s26 + $0x10] sm:$0xff]  }
   0xf   :  { %v2183_v2 = vld [vmem:[%s3021_s26 + $0xc0] sm:$0xff]   ;;  %1966 = vmatpush3.bf16.msra.mxu0 %v2182_v1  ;;  %v2187_v6 = vld [vmem:[%s3021_s26 + $0xc8] sm:$0xff]   ;;  %v2191_v10 = vld [vmem:[%s3021_s26 + $0xd0] sm:$0xff]  }
  0x10   :  { %v2184_v3 = vld [vmem:[%s3021_s26 + $0x80] sm:$0xff]   ;;  %1987 = vmatprep.subr.bf16.mxu1 %v2183_v2  ;;  %1967 = vmatprep.subr.bf16.mxu0 %v2185_v4  ;;  %v2188_v7 = vld [vmem:[%s3021_s26 + $0x88] sm:$0xff]   ;;  %v2192_v11 = vld [vmem:[%s3021_s26 + $0x90] sm:$0xff]  }
  0x11   :  { %1988 = vmatpush3.bf16.msra.mxu1 %v2184_v3  ;;  %v2193_v12 = vld [vmem:[%s3021_s26 + $0x58] sm:$0xff]   ;;  %v2197_v16 = vld [vmem:[%s3021_s26 + $0x60] sm:$0xff]   ;;  %v2201_v20 = vld [vmem:[%s3021_s26 + $0x68] sm:$0xff]  }
  0x12   :  { %1989 = vmatprep.subr.bf16.mxu1 %v2187_v6  ;;  %v2194_v13 = vld [vmem:[%s3021_s26 + $0x18] sm:$0xff]   ;;  %v2198_v17 = vld [vmem:[%s3021_s26 + $0x20] sm:$0xff]   ;;  %v2202_v21 = vld [vmem:[%s3021_s26 + $0x28] sm:$0xff]  }
  0x13   :  { %1968 = vmatpush3.bf16.msra.mxu0 %v2186_v5  ;;  %v2195_v14 = vld [vmem:[%s3021_s26 + $0xd8] sm:$0xff]   ;;  %v2199_v18 = vld [vmem:[%s3021_s26 + $0xe0] sm:$0xff]   ;;  %v2203_v22 = vld [vmem:[%s3021_s26 + $0xe8] sm:$0xff]  }
  0x14   :  { %1969 = vmatprep.subr.bf16.mxu0 %v2189_v8  ;;  %v2196_v15 = vld [vmem:[%s3021_s26 + $0x98] sm:$0xff]   ;;  %v2200_v19 = vld [vmem:[%s3021_s26 + $0xa0] sm:$0xff]   ;;  %v2204_v23 = vld [vmem:[%s3021_s26 + $0xa8] sm:$0xff]  }
  0x15   :  { %1990 = vmatpush3.bf16.msra.mxu1 %v2188_v7  ;;  %v2205_v24 = vld [vmem:[%s3021_s26 + $0x70] sm:$0xff]   ;;  %v2209_v28 = vld [vmem:[%s3021_s26 + $0x78] sm:$0xff]   ;;  %v71_v31 = vld [vmem:[%s3022_s30 + $0x8] sm:$0xff] }
  0x16   :  { %1991 = vmatprep.subr.bf16.mxu1 %v2191_v10  ;;  %v2206_v25 = vld [vmem:[%s3021_s26 + $0x30] sm:$0xff]   ;;  %v2210_v29 = vld [vmem:[%s3021_s26 + $0x38] sm:$0xff]   ;;  %v78_v32 = vpack.c.bf16 %v71_v31, %v71_v31  ;;  %v70_v34 = vld [vmem:[%s3022_s30] sm:$0xff] }
  0x17   :  { %1970 = vmatpush3.bf16.msra.mxu0 %v2190_v9  ;;  %v2207_v26 = vld [vmem:[%s3021_s26 + $0xf0] sm:$0xff]   ;;  %v2211_v30 = vld [vmem:[%s3021_s26 + $0xf8] sm:$0xff]   ;;  %v77_v35 = vpack.c.bf16 %v70_v34, %v70_v34  ;;  %v2213_v36 = vld [vmem:[%s3021_s26 + $0x140] sm:$0xff]  }
  0x18   :  { %1971 = vmatprep.subr.bf16.mxu0 %v2193_v12  ;;  %v2208_v27 = vld [vmem:[%s3021_s26 + $0xb0] sm:$0xff]   ;;  %v2212_v33 = vld [vmem:[%s3021_s26 + $0xb8] sm:$0xff]   ;;  %519 = vmatprep.mubr.bf16.mxu0 %v78_v32  ;;  %v2214_v39 = vld [vmem:[%s3021_s26 + $0x100] sm:$0xff]  }
  0x19   :  { %1992 = vmatpush3.bf16.msra.mxu1 %v2192_v11  ;;  %v73_v37 = vld [vmem:[%s3022_s30 + $0x18] sm:$0xff]  ;;  %v72_v40 = vld [vmem:[%s3022_s30 + $0x10] sm:$0xff]  ;;  %v2215_v42 = vld [vmem:[%s3021_s26 + $0x148] sm:$0xff]  }
  0x1a   :  { %1993 = vmatprep.subr.bf16.mxu1 %v2195_v14  ;;  %v80_v38 = vpack.c.bf16 %v73_v37, %v73_v37  ;;  %v79_v41 = vpack.c.bf16 %v72_v40, %v72_v40  ;;  %v2216_v43 = vld [vmem:[%s3021_s26 + $0x108] sm:$0xff]   ;;  %v2217_v45 = vld [vmem:[%s3021_s26 + $0x150] sm:$0xff]   ;;  %v2219_v47 = vld [vmem:[%s3021_s26 + $0x158] sm:$0xff]  }
  0x1b   :  { %1972 = vmatpush3.bf16.msra.mxu0 %v2194_v13  ;;  %v2218_v46 = vld [vmem:[%s3021_s26 + $0x110] sm:$0xff]   ;;  %v2220_v48 = vld [vmem:[%s3021_s26 + $0x118] sm:$0xff]   ;;  %v2221_v49 = vld [vmem:[%s3021_s26 + $0x160] sm:$0xff]  }
  0x1c   :  { %1973 = vmatprep.subr.bf16.mxu0 %v2197_v16  ;;  %559 = vmatprep.mubr.bf16.mxu1 %v80_v38  ;;  %v2222_v50 = vld [vmem:[%s3021_s26 + $0x120] sm:$0xff]   ;;  %v2223_v51 = vld [vmem:[%s3021_s26 + $0x168] sm:$0xff]   ;;  %v2225_v55 = vld [vmem:[%s3021_s26 + $0x170] sm:$0xff]  }
  0x1d   :  { %1994 = vmatpush3.bf16.msra.mxu1 %v2196_v15  ;;  %v2224_v52 = vld [vmem:[%s3021_s26 + $0x128] sm:$0xff]   ;;  %v2229_v53 = vld [vmem:[%s3021_s26 + $0x180] sm:$0xff]   ;;  %v76_v57 = vld [vmem:[%s3022_s30 + $0x30] sm:$0xff] }
  0x1e   :  { %1995 = vmatprep.subr.bf16.mxu1 %v2199_v18  ;;  %v75_v54 = vld [vmem:[%s3022_s30 + $0x28] sm:$0xff]  ;;  %v83_v58 = vpack.c.bf16 %v76_v57, %v76_v57  ;;  %v2226_v59 = vld [vmem:[%s3021_s26 + $0x130] sm:$0xff]   ;;  %v2227_v60 = vld [vmem:[%s3021_s26 + $0x178] sm:$0xff]  }
  0x1f   :  { %1974 = vmatpush3.bf16.msra.mxu0 %v2198_v17  ;;  %v82_v56 = vpack.c.bf16 %v75_v54, %v75_v54  ;;  %v2228_v61 = vld [vmem:[%s3021_s26 + $0x138] sm:$0xff]   ;;  %v74_v62 = vld [vmem:[%s3022_s30 + $0x20] sm:$0xff] }
  0x20   :  { %1975 = vmatprep.subr.bf16.mxu0 %v2201_v20  ;;  %v81_v63 = vpack.c.bf16 %v74_v62, %v74_v62 }
  0x21   :  { %1996 = vmatpush3.bf16.msra.mxu1 %v2200_v19 }
  0x22   :  { %1997 = vmatprep.subr.bf16.mxu1 %v2203_v22 }
  0x23   :  { %1976 = vmatpush3.bf16.msra.mxu0 %v2202_v21 }
  0x24   :  { %1977 = vmatprep.subr.bf16.mxu0 %v2205_v24 }
  0x25   :  { %1998 = vmatpush3.bf16.msra.mxu1 %v2204_v23 }
  0x26   :  { %1999 = vmatprep.subr.bf16.mxu1 %v2207_v26 }
  0x27   :  { %1978 = vmatpush3.bf16.msra.mxu0 %v2206_v25 }
  0x28   :  { %1979 = vmatprep.subr.bf16.mxu0 %v2209_v28 }
  0x29   :  { %2000 = vmatpush3.bf16.msra.mxu1 %v2208_v27 }
  0x2a   :  { %2001 = vmatprep.subr.bf16.mxu1 %v2211_v30 }
  0x2b   :  { %1980 = vmatpush3.bf16.msra.mxu0 %v2210_v29 }
  0x2c   :  { %2009 = vmatprep.subr.bf16.mxu0 %v2213_v36 }
  0x2d   :  { %2002 = vmatpush3.bf16.msra.mxu1 %v2212_v33 }
  0x2e   :  { %520 = vmatmul.mubr.bf16.vlgmr.msra.gmra.mrb[0].mxu0 %v77_v35  ;;  %2073 = vmatprep.subr.bf16.mxu1 %v2369_v44 }
  0x2f   :  { %2010 = vmatpush3.bf16.msra.mxu0 %v2214_v39  ;;  %599 = vmatprep.mubr.bf16.mxu0 %v82_v56 }
  0x30   :  { %560 = vmatmul.mubr.bf16.vlgmr.msra.gmra.mrb[0].mxu1 %v79_v41  ;;  %2011 = vmatprep.subr.bf16.mxu0 %v2215_v42 }
  0x31   :  { %2075 = vmatprep.mubr.msk.bf16.mxu1 %vm2370_vm0, %v2369_v44  ;;  %2074 = vmatpush3.bf16.msra.mxu1 %v2229_v53 }
  0x32   :  { %2079 = vmatprep.subr.bf16.mxu1 %v2369_v44 }
  0x33   :  { %2012 = vmatpush3.bf16.msra.mxu0 %v2216_v43 }
  0x34   :  { %2013 = vmatprep.subr.bf16.mxu0 %v2217_v45 }
  0x37   :  { %2014 = vmatpush3.bf16.msra.mxu0 %v2218_v46 }
  0x38   :  { %2015 = vmatprep.subr.bf16.mxu0 %v2219_v47  ;;  %2076 = vmatmul.mubr.msk.bf16.vlgmr.msra.gmra.mrb[4].mxu1 %vm483_vm1, %v83_v58 }
  0x39   :  { %2095 = vmatprep.mubr.msk.bf16.mxu1 %vm2370_vm0, %v2369_v44 }
  0x3b   :  { %2016 = vmatpush3.bf16.msra.mxu0 %v2220_v48 }
  0x3c   :  { %2017 = vmatprep.subr.bf16.mxu0 %v2221_v49 }
  0x3f   :  { %2018 = vmatpush3.bf16.msra.mxu0 %v2222_v50 }
  0x40   :  { %2019 = vmatprep.subr.bf16.mxu0 %v2223_v51 }
  0x43   :  { %2020 = vmatpush3.bf16.msra.mxu0 %v2224_v52 }
  0x44   :  { %2021 = vmatprep.subr.bf16.mxu0 %v2225_v55 }
  0x47   :  { %2022 = vmatpush3.bf16.msra.mxu0 %v2226_v59 }
  0x48   :  { %2023 = vmatprep.subr.bf16.mxu0 %v2227_v60 }
  0x4b   :  { %2024 = vmatpush3.bf16.msra.mxu0 %v2228_v61 }
  0x4c   :  { %2099 = vmatprep.subr.bf16.mxu0 %v2369_v44 }
  0x4e   :  { %600 = vmatmul.mubr.bf16.vlgmr.msra.gmra.mrb[4].mxu0 %v81_v63 }
  0x4f   :  { %2107 = vmatprep.mubr.msk.bf16.mxu0 %vm2370_vm0, %v2369_v44 }
  0x50   :  { %26 = vsyncpa [#allocation3], 0  ;;  %s3023_s0 = sld [smem:[#allocation8_spill]]  ;;  %s3024_s30 = sld [smem:[#allocation10_spill]]  ;;  %v2242_v38 = vld [vmem:[%s2996_s7] sm:$0xff]   ;;  %vm801_vm2 = vcmask 523264  }
  0x51   :  { %s3025_s1 = sld [smem:[#allocation7_spill]]  ;;  %s3026_s4 = sld [smem:[#allocation9_spill]]  ;;  %v2243_v48 = vld [vmem:[%s2996_s7 + $0x8] sm:$0xff]   ;;  %v1882_v49 = vld [vmem:[%s2995_s6] ss:$0 sm:$0xff]  ;;  %vm870_vm3 = vcmask 261120  }
  0x52   :  { %v2244_v56 = vld [vmem:[%s2998_s9] sm:$0xff]   ;;  %vm988_vm4 = vcmask 1043456   ;;  %vm984_vm5 = vcmask 64512  }
  0x53   :  { %v1888_v58 = vld [vmem:[%s2997_s8] ss:$0 sm:$0xff] }
  0x54   :  { %v976_v63 = vld [vmem:[%s3000_s11] sm:$0xf] }
  0x56   :  { %v2230_v0 = vld [vmem:[%s3023_s0] sm:$0xff]   ;;  %v2231_v1 = vld [vmem:[%s3023_s0 + $0x8] sm:$0xff]   ;;  %v2232_v2 = vld [vmem:[%s3023_s0 + $0x10] sm:$0xff]  }
  0x57   :  { %2080 = vmatpush3.bf16.msra.mxu1 %v2230_v0  ;;  %v2233_v3 = vld [vmem:[%s3023_s0 + $0x18] sm:$0xff]   ;;  %v2234_v4 = vld [vmem:[%s3023_s0 + $0x20] sm:$0xff]   ;;  %v2235_v5 = vld [vmem:[%s3023_s0 + $0x28] sm:$0xff]  }
  0x58   :  { %2081 = vmatprep.subr.bf16.mxu1 %v2369_v44  ;;  %v2236_v6 = vld [vmem:[%s3023_s0 + $0x30] sm:$0xff]   ;;  %v2237_v7 = vld [vmem:[%s3023_s0 + $0x38] sm:$0xff]   ;;  %v2238_v8 = vld [vmem:[%s3024_s30] sm:$0xff]  }
  0x59   :  { %2100 = vmatpush3.bf16.msra.mxu0 %v2238_v8  ;;  %v2239_v9 = vld [vmem:[%s3024_s30 + $0x8] sm:$0xff]   ;;  %v1822_v11 = vld [vmem:[%s3025_s1] ss:$0 sm:$0xff]  ;;  %v2240_v36 = vld [vmem:[%s3024_s30 + $0x10] sm:$0xff]  }
  0x5a   :  { %2101 = vmatprep.subr.bf16.mxu0 %v2369_v44  ;;  %v2241_v37 = vld [vmem:[%s3024_s30 + $0x18] sm:$0xff]   ;;  %v1873_v39 = vld [vmem:[%s3026_s4] ss:$0 sm:$0xff] }
  0x5b   :  { %2082 = vmatpush3.bf16.msra.mxu1 %v2231_v1 }
  0x5c   :  { %2083 = vmatprep.subr.bf16.mxu1 %v2369_v44 }
  0x5d   :  { %2102 = vmatpush3.bf16.msra.mxu0 %v2239_v9 }
  0x5e   :  { %2103 = vmatprep.subr.bf16.mxu0 %v2369_v44 }
  0x5f   :  { %2084 = vmatpush3.bf16.msra.mxu1 %v2232_v2 }
  0x60   :  { %2085 = vmatprep.subr.bf16.mxu1 %v2369_v44 }
  0x61   :  { %2104 = vmatpush3.bf16.msra.mxu0 %v2240_v36  ;;  %v2251_v36 = vld [vmem:[%s3008_s19] ss:$28 sps:$4 sm:$0xff]  }
  0x62   :  { %2105 = vmatprep.subr.bf16.mxu0 %v2369_v44 }
  0x63   :  { %2086 = vmatpush3.bf16.msra.mxu1 %v2233_v3  ;;  %v990_v3 = vsel %vm988_vm4, %v976_v63, 0  ;;  %v2268_v63 = vld [vmem:[%s3008_s19 + $0x7c] ss:$28 sps:$4 sm:$0xff]  }
  0x64   :  { %2087 = vmatprep.subr.bf16.mxu1 %v2369_v44 }
  0x65   :  { %2106 = vmatpush3.bf16.msra.mxu0 %v2241_v37  ;;  %v2253_v37 = vld [vmem:[%s3008_s19 + $0x4] ss:$28 sps:$4 sm:$0xff]  }
  0x66   :  { %2131 = vmatprep.subr.bf16.mxu0 %v2369_v44 }
  0x67   :  { %2088 = vmatpush3.bf16.msra.mxu1 %v2234_v4  ;;  %v1034_v4 = vld [vmem:[%s3002_s13] sm:$0xf] }
  0x68   :  { %2089 = vmatprep.subr.bf16.mxu1 %v2369_v44 }
  0x6b   :  { %2090 = vmatpush3.bf16.msra.mxu1 %v2235_v5  ;;  %v1046_v5 = vsel %vm988_vm4, %v1034_v4, 0  ;;  %v2278_v4 = vld [vmem:[%s3008_s19 + $0xe8] ss:$28 sps:$4 sm:$0xff]  }
  0x6c   :  { %2091 = vmatprep.subr.bf16.mxu1 %v2369_v44 }
  0x6f   :  { %2092 = vmatpush3.bf16.msra.mxu1 %v2236_v6  ;;  %v1892_v6 = vld [vmem:[%s2999_s10] ss:$0 sm:$0xff] }
  0x70   :  { %2093 = vmatprep.subr.bf16.mxu1 %v2369_v44 }
  0x73   :  { %2094 = vmatpush3.bf16.msra.mxu1 %v2237_v7 }
  0x74   :  { %2111 = vmatprep.subr.bf16.mxu1 %v2369_v44 }
 0x101   :  { %v1981_v10 = vpop.f32.mrb[0].mxu0 }
 0x102   :  { %v1982_v12 = vpop.f32.mrb[1].mxu0 }
 0x103   :  { %v1983_v13 = vadd.f32 %v1982_v12, %v1981_v10  ;;  %v1984_v14 = vpop.f32.mrb[2].mxu0  ;;  %v2003_v15 = vpop.f32.mrb[0].mxu1 }
 0x104   :  { %v1985_v16 = vpop.f32.mrb[3].mxu0  ;;  %v2004_v18 = vpop.f32.mrb[1].mxu1  ;;  %v2245_v14 = vld [vmem:[%s3004_s15] sm:$0xff]  }
 0x105   :  { %v522_v17 = vadd.f32 %v1983_v13, %v1822_v11  ;;  %v2005_v19 = vadd.f32 %v2004_v18, %v2003_v15  ;;  %v2006_v20 = vpop.f32.mrb[2].mxu1  ;;  %v1895_v15 = vld [vmem:[%s3001_s12] ss:$0 sm:$0xff] }
 0x106   :  { %v2007_v21 = vpop.f32.mrb[3].mxu1 }
 0x107   :  { %v562_v22 = vadd.f32 %v2005_v19, %v522_v17 }
 0x10b   :  { %v641_v23 = vpop.f32.mrb[4].mxu1 }
 0x10c   :  { %v2077_v24 = vpop.f32.mrb[5].mxu1 }
 0x10d   :  { %v644_v25 = vpop.f32.mrb[6].mxu1  ;;  %v2247_v24 = vld [vmem:[%s3006_s17] sm:$0xff]  }
 0x10e   :  { %v2078_v26 = vpop.f32.mrb[7].mxu1  ;;  %v2248_v25 = vld [vmem:[%s3006_s17 + $0x8] sm:$0xff]  }
 0x10f   :  { %v1897_v26 = vld [vmem:[%s3003_s14] ss:$0 sm:$0xff] }
 0x121   :  { %v2025_v27 = vpop.f32.mrb[4].mxu0 }
 0x122   :  { %v2026_v28 = vpop.f32.mrb[5].mxu0 }
 0x123   :  { %v2027_v29 = vadd.f32 %v2026_v28, %v2025_v27  ;;  %v2028_v30 = vpop.f32.mrb[6].mxu0 }
 0x124   :  { %v2029_v31 = vpop.f32.mrb[7].mxu0 }
 0x125   :  { %v602_v32 = vadd.f32 %v2027_v29, %v562_v22 }
 0x127   :  { %v642_v33 = vadd.f32 %v641_v23, %v602_v32  ;;  %v2246_v23 = vld [vmem:[%s3004_s15 + $0x8] sm:$0xff]  }
 0x129   :  { %v647_v34 = vmax.f32 %v642_v33, 0.0 }
 0x12b   :  { %v648_v35 = vpack.c.bf16 %v647_v34, %v647_v34  ;;  %v2249_v34 = vld [vmem:[%s3006_s17 + $0x10] sm:$0xff]  }
 0x12d   :  { %2096 = vmatmul.mubr.bf16.vlgmr.msra.gmra.mrb[8].mxu1 %v648_v35  ;;  %v2250_v35 = vld [vmem:[%s3006_s17 + $0x18] sm:$0xff]  }
 0x12e   :  { %2115 = vmatprep.mubr.msk.bf16.mxu1 %vm2370_vm0, %v2369_v44  ;;  %2112 = vmatpush3.bf16.msra.mxu1 %v2242_v38  ;;  %v2256_v38 = vld [vmem:[%s3008_s19 + $0xc] ss:$28 sps:$4 sm:$0xff]  }
 0x12f   :  { %2113 = vmatprep.subr.bf16.mxu1 %v2369_v44 }
 0x132   :  { %2114 = vmatpush3.bf16.msra.mxu1 %v2243_v48  ;;  %v2283_v48 = vld [vmem:[%s3008_s19 + $0x11c] ss:$28 sps:$4 sm:$0xff]  }
 0x133   :  { %2119 = vmatprep.subr.bf16.mxu1 %v2369_v44 }
 0x200   :  { %v754_v40 = vpop.f32.mrb[8].mxu1 }
 0x201   :  { %v755_v41 = vadd.f32 %v1873_v39, %v754_v40  ;;  %v2097_v42 = vpop.f32.mrb[9].mxu1  ;;  %v2259_v39 = vld [vmem:[%s3008_s19 + $0x3c] ss:$28 sps:$4 sm:$0xff]  }
 0x202   :  { %v757_v43 = vpop.f32.mrb[10].mxu1  ;;  %v2257_v40 = vld [vmem:[%s3008_s19 + $0x38] ss:$28 sps:$4 sm:$0xff]   ;;  %v2263_v42 = vld [vmem:[%s3008_s19 + $0x70] ss:$28 sps:$4 sm:$0xff]  }
 0x203   :  { %v760_v45 = vmax.f32 %v755_v41, 0.0  ;;  %v2098_v46 = vpop.f32.mrb[11].mxu1  ;;  %v2265_v41 = vld [vmem:[%s3008_s19 + $0x74] ss:$28 sps:$4 sm:$0xff]   ;;  %v2271_v43 = vld [vmem:[%s3008_s19 + $0xac] ss:$28 sps:$4 sm:$0xff]  }
 0x204   :  { %v2277_v46 = vld [vmem:[%s3008_s19 + $0xe4] ss:$28 sps:$4 sm:$0xff]  }
 0x205   :  { %v761_v47 = vpack.c.bf16 %v760_v45, %v760_v45  ;;  %v2269_v45 = vld [vmem:[%s3008_s19 + $0xa8] ss:$28 sps:$4 sm:$0xff]  }
 0x207   :  { %2108 = vmatmul.mubr.msk.bf16.vlgmr.msra.gmra.mrb[8].mxu0 %vm801_vm2, %v761_v47  ;;  %v2275_v47 = vld [vmem:[%s3008_s19 + $0xe0] ss:$28 sps:$4 sm:$0xff]  }
 0x208   :  { %2133 = vmatprep.mubr.msk.bf16.mxu0 %vm2370_vm0, %v2369_v44  ;;  %2132 = vmatpush3.bf16.msra.mxu0 %v1046_v5  ;;  %v2286_v5 = vld [vmem:[%s3008_s19 + $0x124] ss:$28 sps:$4 sm:$0xff]  }
 0x209   :  { %2145 = vmatprep.subr.bf16.mxu0 %v2369_v44 }
 0x2da   :  { %v839_v50 = vpop.f32.mrb[8].mxu0 }
 0x2db   :  { %v840_v51 = vadd.f32 %v1882_v49, %v839_v50  ;;  %v2109_v52 = vpop.f32.mrb[9].mxu0  ;;  %v2281_v49 = vld [vmem:[%s3008_s19 + $0x118] ss:$28 sps:$4 sm:$0xff]  }
 0x2dc   :  { %v842_v53 = vpop.f32.mrb[10].mxu0  ;;  %v2289_v50 = vld [vmem:[%s3008_s19 + $0x154] ss:$28 sps:$4 sm:$0xff]   ;;  %v1899_v52 = vld [vmem:[%s3005_s16] ss:$0 sm:$0xff] }
 0x2dd   :  { %v845_v54 = vmax.f32 %v840_v51, 0.0  ;;  %v2110_v55 = vpop.f32.mrb[11].mxu0  ;;  %v2287_v51 = vld [vmem:[%s3008_s19 + $0x150] ss:$28 sps:$4 sm:$0xff]  }
 0x2df   :  { %v846_v57 = vpack.c.bf16 %v845_v54, %v845_v54 }
 0x2e1   :  { %2116 = vmatmul.mubr.msk.bf16.vlgmr.msra.gmra.mrb[12].mxu1 %vm870_vm3, %v846_v57 }
 0x2e2   :  { %2120 = vmatpush3.bf16.msra.mxu1 %v2244_v56  ;;  %2121 = vmatprep.mubr.msk.bf16.mxu1 %vm2370_vm0, %v2369_v44 }
 0x2e3   :  { %2125 = vmatprep.subr.bf16.mxu1 %v2369_v44 }
 0x3b4   :  { %v908_v59 = vpop.f32.mrb[12].mxu1 }
 0x3b5   :  { %v909_v60 = vadd.f32 %v1888_v58, %v908_v59  ;;  %v2117_v61 = vpop.f32.mrb[13].mxu1  ;;  %v2254_v59 = vld [vmem:[%s3008_s19 + $0x8] ss:$28 sps:$4 sm:$0xff]  }
 0x3b6   :  { %v911_v62 = vpop.f32.mrb[14].mxu1  ;;  %v2262_v61 = vld [vmem:[%s3008_s19 + $0x44] ss:$28 sps:$4 sm:$0xff]  }
 0x3b7   :  { %v914_v0 = vmax.f32 %v909_v60, 0.0  ;;  %v2118_v1 = vpop.f32.mrb[15].mxu1  ;;  %v2260_v62 = vld [vmem:[%s3008_s19 + $0x40] ss:$28 sps:$4 sm:$0xff]  }
 0x3b8   :  { %v2274_v1 = vld [vmem:[%s3008_s19 + $0xb4] ss:$28 sps:$4 sm:$0xff]  }
 0x3b9   :  { %v915_v2 = vpack.c.bf16 %v914_v0, %v914_v0  ;;  %v2266_v0 = vld [vmem:[%s3008_s19 + $0x78] ss:$28 sps:$4 sm:$0xff]  }
 0x3bb   :  { %2122 = vmatmul.mubr.msk.bf16.vlgmr.msra.gmra.mrb[16].mxu1 %vm483_vm1, %v915_v2  ;;  %v2272_v2 = vld [vmem:[%s3008_s19 + $0xb0] ss:$28 sps:$4 sm:$0xff]  }
 0x3bc   :  { %2126 = vmatpush3.bf16.msra.mxu1 %v990_v3  ;;  %2127 = vmatprep.mubr.msk.bf16.mxu1 %vm2370_vm0, %v2369_v44  ;;  %v2280_v3 = vld [vmem:[%s3008_s19 + $0xec] ss:$28 sps:$4 sm:$0xff]  }
 0x3bd   :  { %2137 = vmatprep.subr.bf16.mxu1 %v2369_v44 }
 0x48e   :  { %v968_v7 = vpop.f32.mrb[16].mxu1 }
 0x48f   :  { %v969_v8 = vadd.f32 %v1892_v6, %v968_v7  ;;  %v2123_v9 = vpop.f32.mrb[17].mxu1  ;;  %v2284_v6 = vld [vmem:[%s3008_s19 + $0x120] ss:$28 sps:$4 sm:$0xff]  }
 0x490   :  { %v971_v10 = vpop.f32.mrb[18].mxu1  ;;  %v2292_v7 = vld [vmem:[%s3008_s19 + $0x15c] ss:$28 sps:$4 sm:$0xff]   ;;  %v2295_v9 = vld [vmem:[%s3008_s19 + $0x18c] ss:$28 sps:$4 sm:$0xff]  }
 0x491   :  { %v974_v11 = vmax.f32 %v969_v8, 0.0  ;;  %v2124_v12 = vpop.f32.mrb[19].mxu1  ;;  %v2290_v8 = vld [vmem:[%s3008_s19 + $0x158] ss:$28 sps:$4 sm:$0xff]  }
 0x492   :  { %v2298_v10 = vld [vmem:[%s3008_s19 + $0x194] ss:$28 sps:$4 sm:$0xff]  }
 0x493   :  { %v975_v13 = vpack.c.bf16 %v974_v11, %v974_v11  ;;  %v2293_v11 = vld [vmem:[%s3008_s19 + $0x188] ss:$28 sps:$4 sm:$0xff]   ;;  %v2296_v12 = vld [vmem:[%s3008_s19 + $0x190] ss:$28 sps:$4 sm:$0xff]  }
 0x495   :  { %2128 = vmatmul.mubr.msk.bf16.vlgmr.msra.gmra.mrb[20].mxu1 %vm984_vm5, %v975_v13  ;;  %v2301_v13 = vld [vmem:[%s3008_s19 + $0x14] ss:$28 sps:$4 sm:$0xff]  }
 0x496   :  { %2141 = vmatprep.mubr.msk.bf16.mxu1 %vm2370_vm0, %v2369_v44  ;;  %2138 = vmatpush3.bf16.msra.mxu1 %v2245_v14  ;;  %v2371_v14 = vmov 0  }
 0x497   :  { %2139 = vmatprep.subr.bf16.mxu1 %v2369_v44 }
 0x49a   :  { %2140 = vmatpush3.bf16.msra.mxu1 %v2246_v23  ;;  %v2302_v23 = vld [vmem:[%s3008_s19 + $0x18] ss:$28 sps:$4 sm:$0xff]  }
 0x49b   :  { %1631 = vmatprep.subr.bf16.mxu1 %v2253_v37  ;;  %v2321_v37 = vld [vmem:[%s3008_s19 + $0x12c] ss:$28 sps:$4 sm:$0xff]  }
 0x568   :  { %v1026_v16 = vpop.f32.mrb[20].mxu1 }
 0x569   :  { %v1027_v17 = vadd.f32 %v1895_v15, %v1026_v16  ;;  %v2129_v18 = vpop.f32.mrb[21].mxu1  ;;  %v1903_v15 = vld [vmem:[%s3007_s18] ss:$0 sm:$0xff] }
 0x56a   :  { %v1029_v19 = vpop.f32.mrb[22].mxu1 }
 0x56b   :  { %v1032_v20 = vmax.f32 %v1027_v17, 0.0  ;;  %v2130_v21 = vpop.f32.mrb[23].mxu1 }
 0x56d   :  { %v1033_v22 = vpack.c.bf16 %v1032_v20, %v1032_v20 }
 0x56f   :  { %2134 = vmatmul.mubr.msk.bf16.vlgmr.msra.gmra.mrb[12].mxu0 %vm984_vm5, %v1033_v22  ;;  %v2299_v22 = vld [vmem:[%s3008_s19 + $0x10] ss:$28 sps:$4 sm:$0xff]  }
 0x570   :  { %2153 = vmatprep.mubr.msk.bf16.mxu0 %vm2370_vm0, %v2369_v44  ;;  %2146 = vmatpush3.bf16.msra.mxu0 %v2247_v24 }
 0x571   :  { %2147 = vmatprep.subr.bf16.mxu0 %v2369_v44 }
 0x574   :  { %2148 = vmatpush3.bf16.msra.mxu0 %v2248_v25  ;;  %v2305_v25 = vld [vmem:[%s3008_s19 + $0x4c] ss:$28 sps:$4 sm:$0xff]  }
 0x575   :  { %2149 = vmatprep.subr.bf16.mxu0 %v2369_v44 }
 0x578   :  { %2150 = vmatpush3.bf16.msra.mxu0 %v2249_v34  ;;  %v2317_v34 = vld [vmem:[%s3008_s19 + $0xf4] ss:$28 sps:$4 sm:$0xff]  }
 0x579   :  { %2151 = vmatprep.subr.bf16.mxu0 %v2369_v44 }
 0x57c   :  { %2152 = vmatpush3.bf16.msra.mxu0 %v2250_v35  ;;  %v2315_v35 = vld [vmem:[%s3008_s19 + $0xf0] ss:$28 sps:$4 sm:$0xff]  }
 0x57d   :  { %1672 = vmatprep.subr.bf16.mxu0 %v2256_v38  ;;  %v2319_v38 = vld [vmem:[%s3008_s19 + $0x128] ss:$28 sps:$4 sm:$0xff]  }
 0x642   :  { %v1082_v27 = vpop.f32.mrb[12].mxu0 }
 0x643   :  { %v1083_v28 = vadd.f32 %v1897_v26, %v1082_v27  ;;  %v2135_v29 = vpop.f32.mrb[13].mxu0  ;;  %v2303_v26 = vld [vmem:[%s3008_s19 + $0x48] ss:$28 sps:$4 sm:$0xff]   ;;  %v2306_v27 = vld [vmem:[%s3008_s19 + $0x50] ss:$28 sps:$4 sm:$0xff]  }
 0x644   :  { %v1085_v30 = vpop.f32.mrb[14].mxu0  ;;  %v2307_v29 = vld [vmem:[%s3008_s19 + $0x80] ss:$28 sps:$4 sm:$0xff]  }
 0x645   :  { %v1088_v31 = vmax.f32 %v1083_v28, 0.0  ;;  %v2136_v32 = vpop.f32.mrb[15].mxu0  ;;  %v2309_v28 = vld [vmem:[%s3008_s19 + $0x84] ss:$28 sps:$4 sm:$0xff]  }
 0x646   :  { %v2310_v30 = vld [vmem:[%s3008_s19 + $0x88] ss:$28 sps:$4 sm:$0xff]   ;;  %v2311_v32 = vld [vmem:[%s3008_s19 + $0xb8] ss:$28 sps:$4 sm:$0xff]  }
 0x647   :  { %v1089_v33 = vpack.c.bf16 %v1088_v31, %v1088_v31  ;;  %v2313_v31 = vld [vmem:[%s3008_s19 + $0xbc] ss:$28 sps:$4 sm:$0xff]  }
 0x649   :  { %2142 = vmatmul.mubr.msk.bf16.vlgmr.msra.gmra.mrb[24].mxu1 %vm870_vm3, %v1089_v33  ;;  %v2314_v33 = vld [vmem:[%s3008_s19 + $0xc0] ss:$28 sps:$4 sm:$0xff]  }
 0x64a   :  { %1632 = vmatpush1.bf16.msra.mxu1 %v2251_v36  ;;  %1663 = vmatprep.mubr.bf16.mxu1 %v2371_v14  ;;  %v2318_v36 = vld [vmem:[%s3008_s19 + $0xf8] ss:$28 sps:$4 sm:$0xff]  }
 0x64b   :  { %1633 = vmatprep.subr.bf16.mxu1 %v2259_v39  ;;  %v2322_v39 = vld [vmem:[%s3008_s19 + $0x130] ss:$28 sps:$4 sm:$0xff]  }
 0x64e   :  { %1634 = vmatpush1.bf16.msra.mxu1 %v2257_v40  ;;  %v2325_v40 = vld [vmem:[%s3008_s19 + $0x164] ss:$28 sps:$4 sm:$0xff]  }
 0x64f   :  { %1635 = vmatprep.subr.bf16.mxu1 %v2265_v41  ;;  %v2323_v41 = vld [vmem:[%s3008_s19 + $0x160] ss:$28 sps:$4 sm:$0xff]  }
 0x652   :  { %1636 = vmatpush1.bf16.msra.mxu1 %v2263_v42  ;;  %v2326_v42 = vld [vmem:[%s3008_s19 + $0x168] ss:$28 sps:$4 sm:$0xff]  }
 0x653   :  { %1637 = vmatprep.subr.bf16.mxu1 %v2271_v43  ;;  %v2329_v43 = vld [vmem:[%s3008_s19 + $0x19c] ss:$28 sps:$4 sm:$0xff]  }
 0x656   :  { %1638 = vmatpush1.bf16.msra.mxu1 %v2269_v45  ;;  %v2327_v45 = vld [vmem:[%s3008_s19 + $0x198] ss:$28 sps:$4 sm:$0xff]  }
 0x657   :  { %1639 = vmatprep.subr.bf16.mxu1 %v2277_v46  ;;  %v2330_v46 = vld [vmem:[%s3008_s19 + $0x1a0] ss:$28 sps:$4 sm:$0xff]   ;;  %s2372_s19 = smov [#allocation2]  }
 0x65a   :  { %1640 = vmatpush1.bf16.msra.mxu1 %v2275_v47  ;;  %v1308_v47 = vlaneseq }
 0x65b   :  { %1641 = vmatprep.subr.bf16.mxu1 %v2283_v48 }
 0x65c   :  { %v1309_v48 = vshrl.u32 %v1308_v47, 7 }
 0x65e   :  { %1642 = vmatpush1.bf16.msra.mxu1 %v2281_v49  ;;  %v1310_v49 = vsub.s32 0, %v1309_v48 }
 0x65f   :  { %1643 = vmatprep.subr.bf16.mxu1 %v2289_v50  ;;  %v1318_v50 = vsub.s32 2, %v1309_v48 }
 0x662   :  { %1644 = vmatpush1.bf16.msra.mxu1 %v2287_v51  ;;  %v1306_v51 = vld [vmem:[%s3009_s20] sm:$0x7f]  ;;  %s1814_s20 = sshll.u32 %s2372_s19, 4  ;;  %s1815_s20 = int_to_ptr.vmem [resolvable:$true] %s1814_s20 }
 0x663   :  { %1645 = vmatprep.subr.bf16.mxu1 %v2295_v9  ;;  %v1326_v9 = vsub.s32 4, %v1309_v48  ;;  %s2345_s25 = scalar_lea.vmem %s1815_s20, 896  ;;  %p2350_p1 = scmp.lt.s32.totalorder %s1815_s20, %s1815_s20 }
 0x664   :  { %p2346_p0 = scmp.ne.s32.totalorder %s1815_s20, %s2345_s25  ;;  %p2351_p2 = scmp.lt.s32.totalorder %s2345_s25, %s2345_s25 }
 0x666   :  { %1646 = vmatpush1.bf16.msra.mxu1 %v2293_v11  ;;  %v1330_v11 = vsub.s32 5, %v1309_v48  ;;  %p2352_p3 = por %p2351_p2, %p2350_p1 }
 0x667   :  { %1713 = vmatprep.subr.bf16.mxu1 %v2301_v13 }
 0x668   :  { %p2353_p4 = pnand %p2352_p3, %p2346_p0 }
 0x71c   :  { %v1150_v53 = vpop.f32.mrb[24].mxu1 }
 0x71d   :  { %v1151_v54 = vadd.f32 %v1899_v52, %v1150_v53  ;;  %v2143_v55 = vpop.f32.mrb[25].mxu1  ;;  %v1314_v52 = vsub.s32 1, %v1309_v48  ;;  %v1322_v53 = vsub.s32 3, %v1309_v48 }
 0x71e   :  { %v1153_v56 = vpop.f32.mrb[26].mxu1  ;;  %v1319_v55 = vrot.slane %v1306_v51, %v1318_v50 }
 0x71f   :  { %v1156_v57 = vmax.f32 %v1151_v54, 0.0  ;;  %v2144_v58 = vpop.f32.mrb[27].mxu1  ;;  %v1311_v54 = vrot.slane %v1306_v51, %v1310_v49  ;;  %v1315_v56 = vrot.slane %v1306_v51, %v1314_v52 }
 0x721   :  { %v1157_v60 = vpack.c.bf16 %v1156_v57, %v1156_v57  ;;  %v1323_v57 = vrot.slane %v1306_v51, %v1322_v53 }
 0x723   :  { %2154 = vmatmul.mubr.msk.bf16.vlgmr.msra.gmra.mrb[16].mxu0 %vm801_vm2, %v1157_v60 }
 0x724   :  { %1673 = vmatpush1.bf16.msra.mxu0 %v2254_v59  ;;  %1704 = vmatprep.mubr.bf16.mxu0 %v2371_v14 }
 0x725   :  { %1674 = vmatprep.subr.bf16.mxu0 %v2262_v61 }
 0x728   :  { %1675 = vmatpush1.bf16.msra.mxu0 %v2260_v62 }
 0x729   :  { %1676 = vmatprep.subr.bf16.mxu0 %v2268_v63 }
 0x72c   :  { %1677 = vmatpush1.bf16.msra.mxu0 %v2266_v0 }
 0x72d   :  { %1678 = vmatprep.subr.bf16.mxu0 %v2274_v1 }
 0x730   :  { %1679 = vmatpush1.bf16.msra.mxu0 %v2272_v2 }
 0x731   :  { %1680 = vmatprep.subr.bf16.mxu0 %v2280_v3 }
 0x734   :  { %1681 = vmatpush1.bf16.msra.mxu0 %v2278_v4 }
 0x735   :  { %1682 = vmatprep.subr.bf16.mxu0 %v2286_v5 }
 0x738   :  { %1683 = vmatpush1.bf16.msra.mxu0 %v2284_v6 }
 0x739   :  { %1684 = vmatprep.subr.bf16.mxu0 %v2292_v7 }
 0x73c   :  { %1685 = vmatpush1.bf16.msra.mxu0 %v2290_v8 }
 0x73d   :  { %1686 = vmatprep.subr.bf16.mxu0 %v2298_v10  ;;  %v1334_v10 = vsub.s32 6, %v1309_v48 }
 0x73f   :  { %v1335_v13 = vrot.slane %v1306_v51, %v1334_v10 }
 0x740   :  { %1687 = vmatpush1.bf16.msra.mxu0 %v2296_v12  ;;  %v1327_v12 = vrot.slane %v1306_v51, %v1326_v9 }
 0x741   :  { %2157 = vmatprep.subr.bf16.mxu0 %v2369_v44 }
 0x7f6   :  { %v1234_v16 = vpop.f32.mrb[16].mxu0 }
 0x7f7   :  { %v1235_v17 = vadd.f32 %v1903_v15, %v1234_v16  ;;  %v2155_v18 = vpop.f32.mrb[17].mxu0 }
 0x7f8   :  { %v1237_v19 = vpop.f32.mrb[18].mxu0 }
 0x7f9   :  { %v1240_v20 = vmax.f32 %v1235_v17, 0.0  ;;  %v2156_v21 = vpop.f32.mrb[19].mxu0 }
 0x7fb   :  { %v1241_v24 = vpack.c.bf16 %v1240_v20, %v1240_v20 }
 0x7fd   :  { %1664 = vmatmul.mubr.bf16.vlgmr.msra.gmra.mrb[28].mxu1 %v1241_v24  ;;  %1705 = vmatmul.mubr.bf16.vlgmr.msra.gmra.mrb[20].mxu0 %v1241_v24 }
 0x7fe   :  { %1714 = vmatpush1.bf16.msra.mxu1 %v2299_v22  ;;  %2158 = vmatpush3.bf16.msra.mxu0 %v2302_v23 }
 0x7ff   :  { %1715 = vmatprep.subr.bf16.mxu1 %v2305_v25  ;;  %2159 = vmatprep.subr.bf16.mxu0 %v2369_v44 }
 0x800   :  { %1745 = vmatprep.mubr.bf16.mxu1 %v2371_v14  ;;  %2173 = vmatprep.mubr.msk.bf16.mxu0 %vm2370_vm0, %v2369_v44  ;;  %v1331_v14 = vrot.slane %v1306_v51, %v1330_v11 }
 0x802   :  { %1716 = vmatpush1.bf16.msra.mxu1 %v2303_v26  ;;  %2160 = vmatpush3.bf16.msra.mxu0 %v2306_v27 }
 0x803   :  { %1717 = vmatprep.subr.bf16.mxu1 %v2309_v28  ;;  %2161 = vmatprep.subr.bf16.mxu0 %v2369_v44 }
 0x806   :  { %1718 = vmatpush1.bf16.msra.mxu1 %v2307_v29  ;;  %2162 = vmatpush3.bf16.msra.mxu0 %v2310_v30 }
 0x807   :  { %1719 = vmatprep.subr.bf16.mxu1 %v2313_v31  ;;  %2163 = vmatprep.subr.bf16.mxu0 %v2369_v44 }
 0x80a   :  { %1720 = vmatpush1.bf16.msra.mxu1 %v2311_v32  ;;  %2164 = vmatpush3.bf16.msra.mxu0 %v2314_v33 }
 0x80b   :  { %1721 = vmatprep.subr.bf16.mxu1 %v2317_v34  ;;  %2165 = vmatprep.subr.bf16.mxu0 %v2369_v44 }
 0x80e   :  { %1722 = vmatpush1.bf16.msra.mxu1 %v2315_v35  ;;  %2166 = vmatpush3.bf16.msra.mxu0 %v2318_v36 }
 0x80f   :  { %1723 = vmatprep.subr.bf16.mxu1 %v2321_v37  ;;  %2167 = vmatprep.subr.bf16.mxu0 %v2369_v44 }
 0x812   :  { %1724 = vmatpush1.bf16.msra.mxu1 %v2319_v38  ;;  %2168 = vmatpush3.bf16.msra.mxu0 %v2322_v39 }
 0x813   :  { %1725 = vmatprep.subr.bf16.mxu1 %v2325_v40  ;;  %2169 = vmatprep.subr.bf16.mxu0 %v2369_v44 }
 0x816   :  { %1726 = vmatpush1.bf16.msra.mxu1 %v2323_v41  ;;  %2170 = vmatpush3.bf16.msra.mxu0 %v2326_v42 }
 0x817   :  { %1727 = vmatprep.subr.bf16.mxu1 %v2329_v43  ;;  %2171 = vmatprep.subr.bf16.mxu0 %v2369_v44 }
 0x81a   :  { %1728 = vmatpush1.bf16.msra.mxu1 %v2327_v45  ;;  %2172 = vmatpush3.bf16.msra.mxu0 %v2330_v46 }
 0x81d   :  { %1746 = vmatmul.mubr.bf16.vlgmr.msra.gmra.mrb[32].mxu1 %v1241_v24  ;;  %2174 = vmatmul.mubr.bf16.vlgmr.msra.gmra.mrb[24].mxu0 %v1241_v24 }
 0x8d0   :  { %v1665_v58 = vpop.f32.mrb[28].mxu1  ;;  %v1706_v44 = vpop.f32.mrb[20].mxu0 }
 0x8d1   :  { %v1666_v59 = vadd.f32 %v1665_v58, %v1311_v54  ;;  %v1707_v60 = vadd.f32 %v1706_v44, %v1319_v55  ;;  %v1667_v61 = vpop.f32.mrb[29].mxu1  ;;  %v1708_v62 = vpop.f32.mrb[21].mxu0 }
 0x8d2   :  { %v1668_v63 = vadd.f32 %v1667_v61, %v1315_v56  ;;  %v1709_v0 = vadd.f32 %v1708_v62, %v1323_v57  ;;  %v1669_v1 = vpop.f32.mrb[30].mxu1  ;;  %v1710_v2 = vpop.f32.mrb[22].mxu0 }
 0x8d3   :  { %2331 = vtanh.f32 %v1666_v59  ;;  %v1670_v3 = vpop.f32.mrb[31].mxu1  ;;  %v1711_v4 = vpop.f32.mrb[23].mxu0 }
 0x8d4   :  { %2333 = vtanh.f32 %v1707_v60 }
 0x8d5   :  { %2335 = vtanh.f32 %v1668_v63 }
 0x8d6   :  { %2337 = vtanh.f32 %v1709_v0 }
 0x8dd   :  { %v2332_v5 = vpop.eup %2331 }
 0x8de   :  { %v2334_v6 = vpop.eup %2333  ;;  %1801 = vst [vmem:[#allocation2] sm:$0xff] %v2332_v5 }
 0x8df   :  { %v2336_v7 = vpop.eup %2335  ;;  %1803 = vst [vmem:[#allocation2 + $0x10] sm:$0xff] %v2334_v6 }
 0x8e0   :  { %v2338_v8 = vpop.eup %2337  ;;  %1802 = vst [vmem:[#allocation2 + $0x8] sm:$0xff] %v2336_v7 }
 0x8e1   :  { %1804 = vst [vmem:[#allocation2 + $0x18] sm:$0xff] %v2338_v8 }
 0x8f0   :  { %v1747_v15 = vpop.f32.mrb[32].mxu1  ;;  %v1788_v16 = vpop.f32.mrb[24].mxu0 }
 0x8f1   :  { %v1748_v17 = vadd.f32 %v1747_v15, %v1327_v12  ;;  %v1789_v18 = vadd.f32 %v1788_v16, %v1335_v13  ;;  %v1749_v19 = vpop.f32.mrb[33].mxu1  ;;  %v2175_v20 = vpop.f32.mrb[25].mxu0 }
 0x8f2   :  { %v1750_v21 = vadd.f32 %v1749_v19, %v1331_v14  ;;  %v1751_v22 = vpop.f32.mrb[34].mxu1  ;;  %v1791_v23 = vpop.f32.mrb[26].mxu0 }
 0x8f3   :  { %2339 = vtanh.f32 %v1748_v17  ;;  %v1752_v24 = vpop.f32.mrb[35].mxu1  ;;  %v2176_v25 = vpop.f32.mrb[27].mxu0 }
 0x8f4   :  { %2341 = vtanh.f32 %v1789_v18 }
 0x8f5   :  { %2343 = vtanh.f32 %v1750_v21 }
 0x8fd   :  { %v2340_v26 = vpop.eup %2339 }
 0x8fe   :  { %v2342_v27 = vpop.eup %2341  ;;  %1805 = vst [vmem:[#allocation2 + $0x20] sm:$0xff] %v2340_v26 }
 0x8ff   :  { %v2344_v28 = vpop.eup %2343  ;;  %1807 = vst.msk [vmem:[#allocation2 + $0x30] sm:$0xff] %vm483_vm1, %v2342_v27 }
 0x900   :  { %1806 = vst [vmem:[#allocation2 + $0x28] sm:$0xff] %v2344_v28 }
 0x901   :  { %2356 = shalt.err (!%p2353_p4)
}
 0x902   :  { %s2357_s27 = scalar_lea.hbm %s3010_s21, 896 }
 0x903   :  { %p2358_p5 = scmp.ne.s32.totalorder %s3010_s21, %s2357_s27  ;;  %p2361_p6 = scmp.lt.u32.totalorder %s2357_s27, %s3010_s21 }
 0x905   :  { %p2363_p7 = pnand %p2361_p6, %p2358_p5 }
 0x907   :  { %2366 = shalt.err (!%p2363_p7)
}
 0x908   :  { %1817 = dma.vmem_to_hbm [thread:$0]  %s1815_s20, 896, %s3010_s21, [#allocation3]  }
 0x909   :  { %2367 = dma.done.wait [#allocation3], 896  }
 0x90a   :  { %2368 = vsyncadd [#allocation3], 4294966400 }
 0x90b   :  { %1821 = vsyncpa [#allocation3], 1 }

</bundles_post_ra>
